<compile_context>
chip_gen: v5e
topology: v5e:2x2
jax: 0.10.0
libtpu: 0.0.40
codegen_flags: <defaults>
</compile_context>

<pallas_src>
import functools

import jax
import jax.numpy as jnp
from jax import lax
from jax.experimental import pallas as pl
from jax.experimental.pallas import tpu as pltpu

HIDDEN = 250          # logical hidden width (matches torch module)
HIDDEN_PAD = 256      # lane-aligned hidden width used inside the kernel
OUT_PAD = 128         # lane-dense output width (real action_dim lives in [:A])


def _round_up(x, m):
    return (x + m - 1) // m * m


def _choose_tb(B):
    """Batch tile: 1 block for tiny batches, >=2 blocks otherwise (v7x 2-TC),
    capped at 512 and a multiple of 128 (v5e MXU split, v6e step amortization)."""
    B8 = _round_up(B, 8)
    if B8 <= 128:
        return B8
    return min(512, _round_up(pl.cdiv(B8, 2), 128))


def _actor_kernel(x_ref, w1_ref, b1_ref, w2_ref, b2_ref, w3_ref, b3_ref,
                  out_ref, *, action_limit_v, action_limit_w):
    # 3 fused matmuls (bf16 MXU inputs, f32 accumulate) + bias/ReLU in f32,
    # then the head squashing as a single tanh pass.
    x = x_ref[...]  # bf16 input tile

    h1 = jnp.dot(x, w1_ref[...], preferred_element_type=jnp.float32)
    h1 = jnp.maximum(h1 + b1_ref[...], 0.0)

    h2 = jnp.dot(h1.astype(jnp.bfloat16), w2_ref[...],
                 preferred_element_type=jnp.float32)
    h2 = jnp.maximum(h2 + b2_ref[...], 0.0)

    a = jnp.dot(h2.astype(jnp.bfloat16), w3_ref[...],
                preferred_element_type=jnp.float32)
    a = a + b3_ref[...]

    # Column 0 -> sigmoid * limit_v ; column 1 -> tanh * limit_w ; rest pass.
    # sigmoid(x) = 0.5 * (1 + tanh(x / 2))  =>  one tanh over the tile.
    col = lax.broadcasted_iota(jnp.int32, a.shape, dimension=1)
    is_v = col == 0
    is_w = col == 1
    t = jnp.tanh(a * jnp.where(is_v, 0.5, 1.0))
    out = jnp.where(is_v, (0.5 * action_limit_v) * (t + 1.0),
                    jnp.where(is_w, action_limit_w * t, a))

    out_ref[...] = out.astype(out_ref.dtype)


def actor_forward(state, params, action_limit_v, action_limit_w):
    """Runs the Actor forward pass in a single Pallas kernel.

    state : (B, state_dim) or (state_dim,) float32
    params: dict with padded bf16 weights w1 (S, 256), w2 (256, 256),
            w3 (256, 128) and f32 biases b1/b2 (1, 256), b3 (1, 128)
            (already transposed vs. torch Linear; padded entries are zero).
    Returns (B, action_dim) or (action_dim,) float32.
    """
    squeeze = state.ndim == 1
    if squeeze:
        state = state[None, :]  # torch 1-D branch

    B, S = state.shape
    A = params["action_dim"]

    TB = _choose_tb(B)
    n_blocks = pl.cdiv(B, TB)

    # Feed the kernel bf16 state: halves the x DMA, removes an in-kernel cast.
    x = state.astype(jnp.bfloat16)

    kernel = functools.partial(
        _actor_kernel,
        action_limit_v=float(action_limit_v),
        action_limit_w=float(action_limit_w),
    )

    # Advisory cost: weights once + x in + lane-dense out; one tanh per output
    # element of the (B, 128) head tile.
    w_bytes = (params["w1"].size + params["w2"].size + params["w3"].size) * 2 \
        + (params["b1"].size + params["b2"].size + params["b3"].size) * 4
    bytes_accessed = w_bytes + B * S * 2 + B * OUT_PAD * 4
    flops = 2 * B * (S * HIDDEN_PAD + HIDDEN_PAD * HIDDEN_PAD
                     + HIDDEN_PAD * OUT_PAD)
    cost = pl.CostEstimate(flops=flops,
                           transcendentals=B * OUT_PAD,
                           bytes_accessed=bytes_accessed)

    grid_spec = pltpu.PrefetchScalarGridSpec(
        num_scalar_prefetch=0,
        grid=(n_blocks,),
        in_specs=[
            pl.BlockSpec((TB, S), lambda i: (i, 0)),                  # x tile
            pl.BlockSpec((S, HIDDEN_PAD), lambda i: (0, 0)),          # w1 (resident)
            pl.BlockSpec((1, HIDDEN_PAD), lambda i: (0, 0)),          # b1
            pl.BlockSpec((HIDDEN_PAD, HIDDEN_PAD), lambda i: (0, 0)), # w2
            pl.BlockSpec((1, HIDDEN_PAD), lambda i: (0, 0)),          # b2
            pl.BlockSpec((HIDDEN_PAD, OUT_PAD), lambda i: (0, 0)),    # w3
            pl.BlockSpec((1, OUT_PAD), lambda i: (0, 0)),             # b3
        ],
        out_specs=pl.BlockSpec((TB, OUT_PAD), lambda i: (i, 0)),
    )

    out_pad = pl.pallas_call(
        kernel,
        out_shape=jax.ShapeDtypeStruct((B, OUT_PAD), jnp.float32),
        grid_spec=grid_spec,
        compiler_params=pltpu.CompilerParams(
            dimension_semantics=("parallel",),
            vmem_limit_bytes=8 * 1024 * 1024,   # ~3 MiB actual + headroom
        ),
        cost_estimate=cost,
    )(x, params["w1"], params["b1"], params["w2"], params["b2"],
      params["w3"], params["b3"])

    out = out_pad[:, :A]
    return out[0] if squeeze else out


def _xavier_uniform(key, fan_in, fan_out):
    # Matches torch.nn.init.xavier_uniform_ (gain=1): U(-a, a),
    # a = sqrt(6/(fan_in+fan_out)). Sample in torch's (out, in) shape then
    # transpose to (in, out) for x @ W.
    limit = jnp.sqrt(6.0 / (fan_in + fan_out))
    w = jax.random.uniform(key, (fan_out, fan_in), jnp.float32, -limit, limit)
    return w.T


def init_actor_params(key, state_dim, action_dim):
    """Xavier-init params, zero-padded to lane-aligned widths, weights in bf16.

    Padded weight rows/cols and padded bias entries are exactly zero, so the
    padded network computes the same function as the 250-wide torch module
    (up to bf16 weight rounding).
    """
    k1, k2, k3 = jax.random.split(key, 3)

    w1 = _xavier_uniform(k1, state_dim, HIDDEN)                    # (S, 250)
    w2 = _xavier_uniform(k2, HIDDEN, HIDDEN)                       # (250, 250)
    w3 = _xavier_uniform(k3, HIDDEN, action_dim)                   # (250, A)

    w1p = jnp.zeros((state_dim, HIDDEN_PAD), jnp.float32).at[:, :HIDDEN].set(w1)
    w2p = jnp.zeros((HIDDEN_PAD, HIDDEN_PAD), jnp.float32) \
        .at[:HIDDEN, :HIDDEN].set(w2)
    w3p = jnp.zeros((HIDDEN_PAD, OUT_PAD), jnp.float32) \
        .at[:HIDDEN, :action_dim].set(w3)

    b1p = jnp.zeros((1, HIDDEN_PAD), jnp.float32).at[:, :HIDDEN].set(0.01)
    b2p = jnp.zeros((1, HIDDEN_PAD), jnp.float32).at[:, :HIDDEN].set(0.01)
    b3p = jnp.zeros((1, OUT_PAD), jnp.float32).at[:, :action_dim].set(0.01)

    return {
        "w1": w1p.astype(jnp.bfloat16),
        "b1": b1p,
        "w2": w2p.astype(jnp.bfloat16),
        "b2": b2p,
        "w3": w3p.astype(jnp.bfloat16),
        "b3": b3p,
        "action_dim": action_dim,
    }


def _actor_reference(state, params, action_limit_v, action_limit_w):
    """Pure-JAX reference mimicking the kernel's bf16 matmul inputs."""
    if state.ndim == 1:
        state = state[None, :]
    A = params["action_dim"]
    x = state.astype(jnp.bfloat16)
    h1 = jnp.maximum(
        jnp.dot(x, params["w1"], preferred_element_type=jnp.float32)
        + params["b1"], 0.0)
    h2 = jnp.maximum(
        jnp.dot(h1.astype(jnp.bfloat16), params["w2"],
                preferred_element_type=jnp.float32) + params["b2"], 0.0)
    a = jnp.dot(h2.astype(jnp.bfloat16), params["w3"],
                preferred_element_type=jnp.float32) + params["b3"]
    a = a[:, :A]
    v = jax.nn.sigmoid(a[:, 0]) * action_limit_v
    w = jnp.tanh(a[:, 1]) * action_limit_w
    return jnp.concatenate([v[:, None], w[:, None], a[:, 2:]], axis=1)


if __name__ == "__main__":
    state_dim = 16
    action_dim = 2
    batch = 4
    action_limit_v = 0.22
    action_limit_w = 2.0

    key = jax.random.PRNGKey(0)
    pkey, skey = jax.random.split(key)
    params = init_actor_params(pkey, state_dim, action_dim)

    # Batched input (torch `else` branch).
    state = jax.random.normal(skey, (batch, state_dim), jnp.float32)
    out = actor_forward(state, params, action_limit_v, action_limit_w)
    out = jax.block_until_ready(out)
    assert out.shape == (batch, action_dim)
    # Head range sanity: col 0 in [0, limit_v], col 1 in [-limit_w, limit_w].
    assert bool(jnp.all(out[:, 0] >= 0.0)) and bool(jnp.all(out[:, 0] <= action_limit_v))
    assert bool(jnp.all(jnp.abs(out[:, 1]) <= action_limit_w))
    # Numeric check vs. pure-JAX reference (same bf16 matmul inputs).
    ref = _actor_reference(state, params, action_limit_v, action_limit_w)
    assert bool(jnp.allclose(out, ref, rtol=1e-2, atol=1e-2))

    # Single-state input (torch 1-D branch).
    out1 = actor_forward(state[0], params, action_limit_v, action_limit_w)
    out1 = jax.block_until_ready(out1)
    assert out1.shape == (action_dim,)

    # Larger batch exercising the multi-block grid with a ragged last block.
    big = jax.random.normal(jax.random.PRNGKey(1), (1000, state_dim), jnp.float32)
    outb = jax.block_until_ready(
        actor_forward(big, params, action_limit_v, action_limit_w))
    assert outb.shape == (1000, action_dim)
    refb = _actor_reference(big, params, action_limit_v, action_limit_w)
    assert bool(jnp.allclose(outb, refb, rtol=1e-2, atol=1e-2))

    print("KERNEL_OK")
</pallas_src>

<mosaic_0001>
module attributes {stable_mosaic.version = 11 : i64} {
  func.func @_actor_kernel(%arg0: i32, %arg1: memref<8x16xbf16, #tpu.memory_space<vmem>>, %arg2: memref<16x256xbf16, #tpu.memory_space<vmem>>, %arg3: memref<1x256xf32, #tpu.memory_space<vmem>>, %arg4: memref<256x256xbf16, #tpu.memory_space<vmem>>, %arg5: memref<1x256xf32, #tpu.memory_space<vmem>>, %arg6: memref<256x128xbf16, #tpu.memory_space<vmem>>, %arg7: memref<1x128xf32, #tpu.memory_space<vmem>>, %arg8: memref<8x128xf32, #tpu.memory_space<vmem>>) attributes {dimension_semantics = [#tpu.dimension_semantics<parallel>], iteration_bounds = array<i64: 1>, scalar_prefetch = 0 : i64, scratch_operands = 0 : i64, tpu.core_type = #tpu.core_type<tc>, window_params = [{transform_indices = @transform_0, window_bounds = array<i64: 8, 16>}, {pipeline_mode = #tpu.pipeline_mode<synchronous>, transform_indices = @transform_1, window_bounds = array<i64: 16, 256>}, {pipeline_mode = #tpu.pipeline_mode<synchronous>, transform_indices = @transform_2, window_bounds = array<i64: 1, 256>}, {pipeline_mode = #tpu.pipeline_mode<synchronous>, transform_indices = @transform_3, window_bounds = array<i64: 256, 256>}, {pipeline_mode = #tpu.pipeline_mode<synchronous>, transform_indices = @transform_4, window_bounds = array<i64: 1, 256>}, {pipeline_mode = #tpu.pipeline_mode<synchronous>, transform_indices = @transform_5, window_bounds = array<i64: 256, 128>}, {pipeline_mode = #tpu.pipeline_mode<synchronous>, transform_indices = @transform_6, window_bounds = array<i64: 1, 128>}, {transform_indices = @transform_7, window_bounds = array<i64: 8, 128>}]} {
    %c0 = arith.constant 0 : index
    %c0_0 = arith.constant 0 : index
    %0 = vector.load %arg1[%c0, %c0_0] : memref<8x16xbf16, #tpu.memory_space<vmem>>, vector<8x16xbf16>
    %c0_1 = arith.constant 0 : index
    %c0_2 = arith.constant 0 : index
    %1 = vector.load %arg2[%c0_1, %c0_2] : memref<16x256xbf16, #tpu.memory_space<vmem>>, vector<16x256xbf16>
    %cst = arith.constant dense<0.000000e+00> : vector<8x256xf32>
    %2 = tpu.matmul %0, %1, %cst {dimension_numbers = #tpu.dot_dimension_numbers<[1], [0], [0], [1], [0, 0, 1, 1], [], []>} : vector<8x16xbf16>, vector<16x256xbf16>, vector<8x256xf32> -> vector<8x256xf32>
    %c0_3 = arith.constant 0 : index
    %c0_4 = arith.constant 0 : index
    %3 = vector.load %arg3[%c0_3, %c0_4] : memref<1x256xf32, #tpu.memory_space<vmem>>, vector<1x256xf32>
    %4 = vector.broadcast %3 : vector<1x256xf32> to vector<8x256xf32>
    %5 = arith.addf %2, %4 : vector<8x256xf32>
    %cst_5 = arith.constant 0.000000e+00 : f32
    %6 = vector.broadcast %cst_5 : f32 to vector<8x256xf32>
    %7 = arith.maximumf %5, %6 : vector<8x256xf32>
    %8 = arith.truncf %7 : vector<8x256xf32> to vector<8x256xbf16>
    %c0_6 = arith.constant 0 : index
    %c0_7 = arith.constant 0 : index
    %9 = vector.load %arg4[%c0_6, %c0_7] : memref<256x256xbf16, #tpu.memory_space<vmem>>, vector<256x256xbf16>
    %cst_8 = arith.constant dense<0.000000e+00> : vector<8x256xf32>
    %10 = tpu.matmul %8, %9, %cst_8 {dimension_numbers = #tpu.dot_dimension_numbers<[1], [0], [0], [1], [0, 0, 1, 1], [], []>} : vector<8x256xbf16>, vector<256x256xbf16>, vector<8x256xf32> -> vector<8x256xf32>
    %c0_9 = arith.constant 0 : index
    %c0_10 = arith.constant 0 : index
    %11 = vector.load %arg5[%c0_9, %c0_10] : memref<1x256xf32, #tpu.memory_space<vmem>>, vector<1x256xf32>
    %12 = vector.broadcast %11 : vector<1x256xf32> to vector<8x256xf32>
    %13 = arith.addf %10, %12 : vector<8x256xf32>
    %cst_11 = arith.constant 0.000000e+00 : f32
    %14 = vector.broadcast %cst_11 : f32 to vector<8x256xf32>
    %15 = arith.maximumf %13, %14 : vector<8x256xf32>
    %16 = arith.truncf %15 : vector<8x256xf32> to vector<8x256xbf16>
    %c0_12 = arith.constant 0 : index
    %c0_13 = arith.constant 0 : index
    %17 = vector.load %arg6[%c0_12, %c0_13] : memref<256x128xbf16, #tpu.memory_space<vmem>>, vector<256x128xbf16>
    %cst_14 = arith.constant dense<0.000000e+00> : vector<8x128xf32>
    %18 = tpu.matmul %16, %17, %cst_14 {dimension_numbers = #tpu.dot_dimension_numbers<[1], [0], [0], [1], [0, 0, 1, 1], [], []>} : vector<8x256xbf16>, vector<256x128xbf16>, vector<8x128xf32> -> vector<8x128xf32>
    %c0_15 = arith.constant 0 : index
    %c0_16 = arith.constant 0 : index
    %19 = vector.load %arg7[%c0_15, %c0_16] : memref<1x128xf32, #tpu.memory_space<vmem>>, vector<1x128xf32>
    %20 = vector.broadcast %19 : vector<1x128xf32> to vector<8x128xf32>
    %21 = arith.addf %18, %20 : vector<8x128xf32>
    %22 = tpu.iota {dimensions = array<i32: 1>} : vector<8x128xi32>
    %c0_i32 = arith.constant 0 : i32
    %23 = vector.broadcast %c0_i32 : i32 to vector<8x128xi32>
    %24 = arith.cmpi eq, %22, %23 : vector<8x128xi32>
    %c1_i32 = arith.constant 1 : i32
    %25 = vector.broadcast %c1_i32 : i32 to vector<8x128xi32>
    %26 = arith.cmpi eq, %22, %25 : vector<8x128xi32>
    %cst_17 = arith.constant 5.000000e-01 : f32
    %cst_18 = arith.constant 1.000000e+00 : f32
    %27 = vector.broadcast %cst_17 : f32 to vector<8x128xf32>
    %28 = vector.broadcast %cst_18 : f32 to vector<8x128xf32>
    %29 = arith.select %24, %27, %28 : vector<8x128xi1>, vector<8x128xf32>
    %30 = arith.mulf %21, %29 : vector<8x128xf32>
    %31 = math.tanh %30 : vector<8x128xf32>
    %cst_19 = arith.constant 1.000000e+00 : f32
    %32 = vector.broadcast %cst_19 : f32 to vector<8x128xf32>
    %33 = arith.addf %31, %32 : vector<8x128xf32>
    %cst_20 = arith.constant 1.100000e-01 : f32
    %34 = vector.broadcast %cst_20 : f32 to vector<8x128xf32>
    %35 = arith.mulf %34, %33 : vector<8x128xf32>
    %cst_21 = arith.constant 2.000000e+00 : f32
    %36 = vector.broadcast %cst_21 : f32 to vector<8x128xf32>
    %37 = arith.mulf %36, %31 : vector<8x128xf32>
    %38 = arith.select %26, %37, %21 : vector<8x128xi1>, vector<8x128xf32>
    %39 = arith.select %24, %35, %38 : vector<8x128xi1>, vector<8x128xf32>
    %c0_22 = arith.constant 0 : index
    %c0_23 = arith.constant 0 : index
    %40 = vector.load %arg8[%c0_22, %c0_23] : memref<8x128xf32, #tpu.memory_space<vmem>>, vector<8x128xf32>
    tpu.vector_store %arg8[%c0_22, %c0_23], %39 {strides = array<i32>} : memref<8x128xf32, #tpu.memory_space<vmem>>, vector<8x128xf32>,
    return
  }
  func.func @transform_0(%arg0: i32) -> (i32, i32) {
    %c0_i32 = arith.constant 0 : i32
    %c0_i32_0 = arith.constant 0 : i32
    return %arg0, %c0_i32 : i32, i32
  }
  func.func @transform_1(%arg0: i32) -> (i32, i32) {
    %c0_i32 = arith.constant 0 : i32
    %c0_i32_0 = arith.constant 0 : i32
    %c0_i32_1 = arith.constant 0 : i32
    return %c0_i32, %c0_i32_0 : i32, i32
  }
  func.func @transform_2(%arg0: i32) -> (i32, i32) {
    %c0_i32 = arith.constant 0 : i32
    %c0_i32_0 = arith.constant 0 : i32
    %c0_i32_1 = arith.constant 0 : i32
    return %c0_i32, %c0_i32_0 : i32, i32
  }
  func.func @transform_3(%arg0: i32) -> (i32, i32) {
    %c0_i32 = arith.constant 0 : i32
    %c0_i32_0 = arith.constant 0 : i32
    %c0_i32_1 = arith.constant 0 : i32
    return %c0_i32, %c0_i32_0 : i32, i32
  }
  func.func @transform_4(%arg0: i32) -> (i32, i32) {
    %c0_i32 = arith.constant 0 : i32
    %c0_i32_0 = arith.constant 0 : i32
    %c0_i32_1 = arith.constant 0 : i32
    return %c0_i32, %c0_i32_0 : i32, i32
  }
  func.func @transform_5(%arg0: i32) -> (i32, i32) {
    %c0_i32 = arith.constant 0 : i32
    %c0_i32_0 = arith.constant 0 : i32
    %c0_i32_1 = arith.constant 0 : i32
    return %c0_i32, %c0_i32_0 : i32, i32
  }
  func.func @transform_6(%arg0: i32) -> (i32, i32) {
    %c0_i32 = arith.constant 0 : i32
    %c0_i32_0 = arith.constant 0 : i32
    %c0_i32_1 = arith.constant 0 : i32
    return %c0_i32, %c0_i32_0 : i32, i32
  }
  func.func @transform_7(%arg0: i32) -> (i32, i32) {
    %c0_i32 = arith.constant 0 : i32
    %c0_i32_0 = arith.constant 0 : i32
    return %arg0, %c0_i32 : i32, i32
  }
}

</mosaic_0001>

<bundles_post_ra>
// kernel: tpu_custom_call.1
= control target key start
LH: loop header
LB: loop body
LE: loop exit
PB: predicated region body
PF: predicated region fallthrough
CT: control target
= control target key end

     0   :  { %12 = vsyncpa [#allocation3], 0  ;;  %s1116_s0 = inlined_call_operand.hbm [shape: bf16[4,16], index: 0, kind: input, shape index: {}]   ;;  %s1117_s1 = inlined_call_operand.hbm [shape: bf16[16,256], index: 1, kind: input, shape index: {}]   ;;  %s1118_s2 = inlined_call_operand.hbm [shape: f32[1,256], index: 2, kind: input, shape index: {}]   ;;  %s1119_s3 = inlined_call_operand.hbm [shape: bf16[256,256], index: 3, kind: input, shape index: {}]   ;;  %s1120_s4 = inlined_call_operand.vmem [shape: f32[1,256], index: 4, kind: input, shape index: {}]   ;;  %s1121_s5 = inlined_call_operand.hbm [shape: bf16[256,128], index: 5, kind: input, shape index: {}]   ;;  %s1122_s6 = inlined_call_operand.vmem [shape: f32[1,128], index: 6, kind: input, shape index: {}]   ;;  %s1123_s7 = inlined_call_operand.hbm [shape: f32[4,128], index: 7, kind: output, shape index: {}]  }
   0x1   :  { %13 = vsyncpa [#allocation6], 0 }
   0x2   :  { %14 = vsyncpa [#allocation9], 0 }
   0x3   :  { %15 = vsyncpa [#allocation4], 0  ;;  %s33_s26 = sshll.u32 %s1117_s1, 4  ;;  %s34_s26 = int_to_ptr.hbm [resolvable:$true] %s33_s26 }
   0x4   :  { %19 = vsyncadd [#allocation3], 32  ;;  %s1029_s27 = smov [#allocation5]   ;;  %s57_s8 = sshll.u32 %s1119_s3, 4  ;;  %s58_s8 = int_to_ptr.hbm [resolvable:$true] %s57_s8 }
   0x5   :  { %s35_s28 = sshll.u32 %s1029_s27, 4  ;;  %s1030_s9 = smov 128   ;;  %s36_s28 = int_to_ptr.vmem [resolvable:$true] %s35_s28 }
   0x6   :  { %s1031_s10 = smov 8   ;;  %s1032_s11 = smov [#allocation8]  }
   0x7   :  { %41 = dma.hbm_to_vmem [thread:$0]  %s34_s26, 256, %s36_s28, [#allocation6], %s1030_s9, %s1030_s9, %s1031_s10  }
   0x8   :  { %s59_s12 = sshll.u32 %s1032_s11, 4  ;;  %s20_s15 = sshll.u32 %s1116_s0, 4  ;;  %s60_s12 = int_to_ptr.vmem [resolvable:$true] %s59_s12  ;;  %s21_s15 = int_to_ptr.hbm [resolvable:$true] %s20_s15 }
   0x9   :  { %65 = dma.hbm_to_vmem [thread:$0]  %s58_s8, 4096, %s60_s12, [#allocation9], %s1030_s9, %s1030_s9, %s1031_s10  }
   0xa   :  { %s1033_s1 = smov [#allocation2]   ;;  %s47_s3 = sshll.u32 %s1118_s2, 4  ;;  %s48_s3 = int_to_ptr.hbm [resolvable:$true] %s47_s3 }
   0xb   :  { %s22_s16 = sshll.u32 %s1033_s1, 4  ;;  %s1034_s19 = smov 32   ;;  %s23_s16 = int_to_ptr.vmem [resolvable:$true] %s22_s16 }
   0xc   :  { %s1035_s20 = smov 2   ;;  %s1036_s21 = smov [#allocation7]  }
   0xd   :  { %28 = dma.hbm_to_vmem [thread:$0]  %s21_s15, 32, %s23_s16, [#allocation3], %s1034_s19, %s1034_s19, %s1035_s20  }
   0xe   :  { %s49_s22 = sshll.u32 %s1036_s21, 4  ;;  %s72_s0 = sshll.u32 %s1121_s5, 4  ;;  %s50_s22 = int_to_ptr.vmem [resolvable:$true] %s49_s22  ;;  %s73_s0 = int_to_ptr.hbm [resolvable:$true] %s72_s0 }
   0xf   :  { %52 = dma.hbm_to_vmem [thread:$0]  %s48_s3, 32, %s50_s22, [#allocation6]  }
  0x10   :  { %s1037_s25 = smov [#allocation10]   ;;  %s1038_s27 = smov 64  }
  0x11   :  { %s74_s26 = sshll.u32 %s1037_s25, 4  ;;  %s1039_s28 = smov 4   ;;  %s75_s26 = int_to_ptr.vmem [resolvable:$true] %s74_s26 }
  0x12   :  { %80 = dma.hbm_to_vmem [thread:$0]  %s73_s0, 2048, %s75_s26, [#allocation9], %s1038_s27, %s1038_s27, %s1039_s28  }
  0x13   :  { %1021 = dma.done.wait [#allocation3], 64  }
  0x14   :  { %1022 = vsyncadd [#allocation3], 4294967232 }
  0x15   :  { %1023 = dma.done.wait [#allocation6], 288  }
  0x16   :  { %1024 = vsyncadd [#allocation6], 4294967008 }
  0x17   :  { %1025 = dma.done.wait [#allocation9], 6144  }
  0x18   :  { %1026 = vsyncadd [#allocation9], 4294961152  ;;  %v611_v0 = vld [vmem:[#allocation5] sm:$0xf]  ;;  %v812_v1 = vld [vmem:[#allocation5 + $0x4] sm:$0xf0] }
  0x19   :  { %v811_v2 = vld [vmem:[#allocation5 + $0x4] sm:$0xf]  ;;  %vm130_vm0 = vcmask 130048   ;;  %v612_v3 = vor.u32 %v812_v1, %v611_v0  ;;  %v613_v4 = vld [vmem:[#allocation5 + $0x8] sm:$0xf0] }
  0x1a   :  { %v104_v5 = vld [vmem:[#allocation2] sm:$0x3]  ;;  %v105_v6 = vld [vmem:[#allocation2 + $0x2] sm:$0x3]  ;;  %v616_v7 = vor.u32 %v811_v2, %v613_v4  ;;  %v677_v8 = vld [vmem:[#allocation8 + $0x70] sm:$0xf] }
  0x1b   :  { %115 = vst [vmem:[#allocation1] ss:$4 sm:$0xff] %v104_v5  ;;  %v828_v9 = vld [vmem:[#allocation8 + $0x74] sm:$0xf0]  ;;  %140 = vmatpush.bf16.msra.mxu0 %v612_v3  ;;  %v741_v11 = vld [vmem:[#allocation8 + $0xf0] sm:$0xf] }
  0x1c   :  { %118 = vst [vmem:[#allocation1 + $0x1] ss:$4 sm:$0xff] %v105_v6  ;;  %v678_v10 = vor.u32 %v828_v9, %v677_v8  ;;  %v844_v12 = vld [vmem:[#allocation8 + $0xf4] sm:$0xf0]  ;;  %153 = vmatpush.bf16.msra.mxu1 %v616_v7  ;;  %v827_v14 = vld [vmem:[#allocation8 + $0x74] sm:$0xf] }
  0x1d   :  { %v742_v13 = vor.u32 %v844_v12, %v741_v11  ;;  %v679_v15 = vld [vmem:[#allocation8 + $0x78] sm:$0xf0]  ;;  %v843_v16 = vld [vmem:[#allocation8 + $0xf4] sm:$0xf]  ;;  %v669_v19 = vld [vmem:[#allocation8 + $0x60] sm:$0xf] }
  0x1e   :  { %361 = vmatpush.bf16.msra.mxu2 %v678_v10  ;;  %v682_v17 = vor.u32 %v827_v14, %v679_v15  ;;  %v743_v18 = vld [vmem:[#allocation8 + $0xf8] sm:$0xf0]  ;;  %v826_v20 = vld [vmem:[#allocation8 + $0x64] sm:$0xf0]  ;;  %v733_v23 = vld [vmem:[#allocation8 + $0xe0] sm:$0xf] }
  0x1f   :  { %374 = vmatpush.bf16.msra.mxu3 %v742_v13  ;;  %v746_v21 = vor.u32 %v843_v16, %v743_v18  ;;  %v670_v22 = vor.u32 %v826_v20, %v669_v19  ;;  %v842_v24 = vld [vmem:[#allocation8 + $0xe4] sm:$0xf0]  ;;  %v825_v25 = vld [vmem:[#allocation8 + $0x64] sm:$0xf]  ;;  %v671_v27 = vld [vmem:[#allocation8 + $0x68] sm:$0xf0] }
  0x20   :  { %387 = vmatpush.bf16.msrb.mxu0 %v682_v17  ;;  %v734_v26 = vor.u32 %v842_v24, %v733_v23  ;;  %v841_v28 = vld [vmem:[#allocation8 + $0xe4] sm:$0xf]  ;;  %v735_v29 = vld [vmem:[#allocation8 + $0xe8] sm:$0xf0]  ;;  %v674_v30 = vor.u32 %v825_v25, %v671_v27  ;;  %v661_v32 = vld [vmem:[#allocation8 + $0x50] sm:$0xf] }
  0x21   :  { %400 = vmatpush.bf16.msrb.mxu1 %v746_v21  ;;  %v738_v31 = vor.u32 %v841_v28, %v735_v29  ;;  %v824_v33 = vld [vmem:[#allocation8 + $0x54] sm:$0xf0]  ;;  %v725_v34 = vld [vmem:[#allocation8 + $0xd0] sm:$0xf]  ;;  %v823_v37 = vld [vmem:[#allocation8 + $0x54] sm:$0xf] }
  0x22   :  { %362 = vmatpush.bf16.msra.mxu2 %v670_v22  ;;  %v662_v35 = vor.u32 %v824_v33, %v661_v32  ;;  %v840_v36 = vld [vmem:[#allocation8 + $0xd4] sm:$0xf0]  ;;  %v663_v38 = vld [vmem:[#allocation8 + $0x58] sm:$0xf0]  ;;  %v839_v41 = vld [vmem:[#allocation8 + $0xd4] sm:$0xf] }
  0x23   :  { %v119_v39 = vld.sshfl [vmem:[#allocation1] sm:$0xff pattern:$0x73625140]  ;;  %375 = vmatpush.bf16.msra.mxu3 %v734_v26  ;;  %v726_v40 = vor.u32 %v840_v36, %v725_v34  ;;  %v727_v42 = vld [vmem:[#allocation8 + $0xd8] sm:$0xf0]  ;;  %v666_v45 = vor.u32 %v823_v37, %v663_v38 }
  0x24   :  { %617 = vmatmul.msk.bf16.vlgmr.msra.gmra.mxu0 %vm130_vm0, %v119_v39  ;;  %618 = vmatmul.msk.bf16.vlgmr.msra.gmra.mxu1 %vm130_vm0, %v119_v39  ;;  %v653_v43 = vld [vmem:[#allocation8 + $0x40] sm:$0xf]  ;;  %v822_v44 = vld [vmem:[#allocation8 + $0x44] sm:$0xf0]  ;;  %v730_v46 = vor.u32 %v839_v41, %v727_v42  ;;  %v821_v49 = vld [vmem:[#allocation8 + $0x44] sm:$0xf] }
  0x25   :  { %388 = vmatpush.bf16.msrb.mxu0 %v674_v30  ;;  %401 = vmatpush.bf16.msrb.mxu1 %v738_v31  ;;  %v717_v47 = vld [vmem:[#allocation8 + $0xc0] sm:$0xf]  ;;  %v838_v48 = vld [vmem:[#allocation8 + $0xc4] sm:$0xf0]  ;;  %v654_v50 = vor.u32 %v822_v44, %v653_v43  ;;  %v655_v51 = vld [vmem:[#allocation8 + $0x48] sm:$0xf0] }
  0x26   :  { %363 = vmatpush.bf16.msra.mxu2 %v662_v35  ;;  %v837_v52 = vld [vmem:[#allocation8 + $0xc4] sm:$0xf]  ;;  %v719_v53 = vld [vmem:[#allocation8 + $0xc8] sm:$0xf0]  ;;  %v718_v54 = vor.u32 %v838_v48, %v717_v47  ;;  %v645_v55 = vld [vmem:[#allocation8 + $0x30] sm:$0xf]  ;;  %v658_v59 = vor.u32 %v821_v49, %v655_v51 }
  0x27   :  { %376 = vmatpush.bf16.msra.mxu3 %v726_v40  ;;  %v820_v56 = vld [vmem:[#allocation8 + $0x34] sm:$0xf0]  ;;  %v709_v57 = vld [vmem:[#allocation8 + $0xb0] sm:$0xf]  ;;  %v722_v60 = vor.u32 %v837_v52, %v719_v53  ;;  %v819_v61 = vld [vmem:[#allocation8 + $0x34] sm:$0xf] }
  0x28   :  { %v836_v58 = vld [vmem:[#allocation8 + $0xb4] sm:$0xf0]  ;;  %v646_v62 = vor.u32 %v820_v56, %v645_v55  ;;  %v647_v63 = vld [vmem:[#allocation8 + $0x38] sm:$0xf0]  ;;  %v835_v0 = vld [vmem:[#allocation8 + $0xb4] sm:$0xf] }
  0x29   :  { %389 = vmatpush.bf16.msrb.mxu0 %v666_v45  ;;  %402 = vmatpush.bf16.msrb.mxu1 %v730_v46  ;;  %v711_v1 = vld [vmem:[#allocation8 + $0xb8] sm:$0xf0]  ;;  %v710_v2 = vor.u32 %v836_v58, %v709_v57  ;;  %v637_v3 = vld [vmem:[#allocation8 + $0x20] sm:$0xf]  ;;  %v818_v4 = vld [vmem:[#allocation8 + $0x24] sm:$0xf0]  ;;  %v650_v7 = vor.u32 %v819_v61, %v647_v63 }
  0x2a   :  { %364 = vmatpush.bf16.msra.mxu2 %v654_v50  ;;  %v701_v5 = vld [vmem:[#allocation8 + $0xa0] sm:$0xf]  ;;  %v834_v6 = vld [vmem:[#allocation8 + $0xa4] sm:$0xf0]  ;;  %v714_v8 = vor.u32 %v835_v0, %v711_v1  ;;  %v817_v9 = vld [vmem:[#allocation8 + $0x24] sm:$0xf]  ;;  %v638_v10 = vor.u32 %v818_v4, %v637_v3 }
  0x2b   :  { %377 = vmatpush.bf16.msra.mxu3 %v718_v54  ;;  %v639_v11 = vld [vmem:[#allocation8 + $0x28] sm:$0xf0]  ;;  %v833_v12 = vld [vmem:[#allocation8 + $0xa4] sm:$0xf]  ;;  %v702_v14 = vor.u32 %v834_v6, %v701_v5  ;;  %v629_v17 = vld [vmem:[#allocation8 + $0x10] sm:$0xf] }
  0x2c   :  { %v703_v13 = vld [vmem:[#allocation8 + $0xa8] sm:$0xf0]  ;;  %v642_v15 = vor.u32 %v817_v9, %v639_v11  ;;  %v816_v18 = vld [vmem:[#allocation8 + $0x14] sm:$0xf0]  ;;  %v693_v19 = vld [vmem:[#allocation8 + $0x90] sm:$0xf] }
  0x2d   :  { %390 = vmatpush.bf16.msrb.mxu0 %v658_v59  ;;  %403 = vmatpush.bf16.msrb.mxu1 %v722_v60  ;;  %v706_v16 = vor.u32 %v833_v12, %v703_v13  ;;  %v630_v20 = vor.u32 %v816_v18, %v629_v17  ;;  %v832_v21 = vld [vmem:[#allocation8 + $0x94] sm:$0xf0]  ;;  %v815_v22 = vld [vmem:[#allocation8 + $0x14] sm:$0xf]  ;;  %v631_v23 = vld [vmem:[#allocation8 + $0x18] sm:$0xf0] }
  0x2e   :  { %365 = vmatpush.bf16.msra.mxu2 %v646_v62  ;;  %v694_v24 = vor.u32 %v832_v21, %v693_v19  ;;  %v634_v25 = vor.u32 %v815_v22, %v631_v23  ;;  %v831_v26 = vld [vmem:[#allocation8 + $0x94] sm:$0xf]  ;;  %v695_v27 = vld [vmem:[#allocation8 + $0x98] sm:$0xf0]  ;;  %v621_v29 = vld [vmem:[#allocation8] sm:$0xf] }
  0x2f   :  { %378 = vmatpush.bf16.msra.mxu3 %v710_v2  ;;  %v698_v28 = vor.u32 %v831_v26, %v695_v27  ;;  %v814_v30 = vld [vmem:[#allocation8 + $0x4] sm:$0xf0]  ;;  %v685_v31 = vld [vmem:[#allocation8 + $0x80] sm:$0xf]  ;;  %v813_v34 = vld [vmem:[#allocation8 + $0x4] sm:$0xf] }
  0x30   :  { %v622_v32 = vor.u32 %v814_v30, %v621_v29  ;;  %v830_v33 = vld [vmem:[#allocation8 + $0x84] sm:$0xf0]  ;;  %v623_v35 = vld [vmem:[#allocation8 + $0x8] sm:$0xf0]  ;;  %v829_v38 = vld [vmem:[#allocation8 + $0x84] sm:$0xf] }
  0x31   :  { %391 = vmatpush.bf16.msrb.mxu0 %v650_v7  ;;  %404 = vmatpush.bf16.msrb.mxu1 %v714_v8  ;;  %v686_v36 = vor.u32 %v830_v33, %v685_v31  ;;  %v626_v37 = vor.u32 %v813_v34, %v623_v35  ;;  %v687_v39 = vld [vmem:[#allocation8 + $0x88] sm:$0xf0]  ;;  %v860_v41 = vld [vmem:[#allocation10 + $0x78] sm:$0xff]  ;;  %v859_v43 = vld [vmem:[#allocation10 + $0x70] sm:$0xff]  ;;  %v1040_v31 = vmov 1.0  }
  0x32   :  { %366 = vmatpush.bf16.msra.mxu2 %v638_v10  ;;  %v690_v40 = vor.u32 %v829_v38, %v687_v39  ;;  %v852_v42 = vld [vmem:[#allocation10 + $0x38] sm:$0xff]  ;;  %v851_v44 = vld [vmem:[#allocation10 + $0x30] sm:$0xff]  ;;  %v858_v45 = vld [vmem:[#allocation10 + $0x68] sm:$0xff] }
  0x33   :  { %379 = vmatpush.bf16.msra.mxu3 %v702_v14  ;;  %v850_v46 = vld [vmem:[#allocation10 + $0x28] sm:$0xff]  ;;  %v857_v47 = vld [vmem:[#allocation10 + $0x60] sm:$0xff]  ;;  %v856_v49 = vld [vmem:[#allocation10 + $0x58] sm:$0xff] }
  0x34   :  { %v849_v48 = vld [vmem:[#allocation10 + $0x20] sm:$0xff]  ;;  %v108_v50 = vld [vmem:[#allocation7] sm:$0x3]  ;;  %v855_v51 = vld [vmem:[#allocation10 + $0x50] sm:$0xff] }
  0x35   :  { %392 = vmatpush.bf16.msrb.mxu0 %v642_v15  ;;  %405 = vmatpush.bf16.msrb.mxu1 %v706_v16  ;;  %v110_v52 = vperm.slane %v108_v50, 0  ;;  %v111_v53 = vperm.slane %v108_v50, 1  ;;  %v848_v0 = vld [vmem:[#allocation10 + $0x18] sm:$0xff]  ;;  %v854_v1 = vld [vmem:[#allocation10 + $0x48] sm:$0xff]  ;;  %v847_v2 = vld [vmem:[#allocation10 + $0x10] sm:$0xff] }
  0x36   :  { %367 = vmatpush.bf16.msra.mxu2 %v630_v20  ;;  %v853_v3 = vld [vmem:[#allocation10 + $0x40] sm:$0xff]  ;;  %v846_v4 = vld [vmem:[#allocation10 + $0x8] sm:$0xff] }
  0x37   :  { %380 = vmatpush.bf16.msra.mxu3 %v694_v24  ;;  %v845_v5 = vld [vmem:[#allocation10] sm:$0xff] }
  0x38   :  { %v195_v6 = vld [vmem:[%s1120_s4] sm:$0x3] }
  0x39   :  { %393 = vmatpush.bf16.msrb.mxu0 %v634_v25  ;;  %406 = vmatpush.bf16.msrb.mxu1 %v698_v28  ;;  %v198_v7 = vperm.slane %v195_v6, 1  ;;  %v197_v11 = vperm.slane %v195_v6, 0  ;;  %v575_v25 = vlaneseq  ;;  %v874_v28 = vld [vmem:[%s1122_s6] ss:$0 sm:$0xff] }
  0x3a   :  { %368 = vmatpush.bf16.msra.mxu2 %v622_v32 }
  0x3b   :  { %381 = vmatpush.bf16.msra.mxu3 %v686_v36  ;;  %v576_v27 = vand.u32 127, %v575_v25 }
  0x3d   :  { %394 = vmatpush.bf16.msrb.mxu0 %v626_v37  ;;  %407 = vmatpush.bf16.msrb.mxu1 %v690_v40  ;;  %vm577_vm1 = vcmp.eq.s32.totalorder %v576_v27, 0  ;;  %vm578_vm2 = vcmp.eq.s32.totalorder %v576_v27, 1 }
  0x3e   :  { %549 = vmatpush.bf16.msrb.mxu2 %v852_v42  ;;  %v579_v32 = vsel %vm577_vm1, 0.5, %v1040_v31 }
  0x3f   :  { %562 = vmatpush.bf16.msrb.mxu3 %v860_v41 }
  0x42   :  { %550 = vmatpush.bf16.msrb.mxu2 %v851_v44 }
  0x43   :  { %563 = vmatpush.bf16.msrb.mxu3 %v859_v43 }
  0x46   :  { %551 = vmatpush.bf16.msrb.mxu2 %v850_v46 }
  0x47   :  { %564 = vmatpush.bf16.msrb.mxu3 %v858_v45 }
  0x4a   :  { %552 = vmatpush.bf16.msrb.mxu2 %v849_v48 }
  0x4b   :  { %565 = vmatpush.bf16.msrb.mxu3 %v857_v47 }
  0x4e   :  { %553 = vmatpush.bf16.msrb.mxu2 %v848_v0 }
  0x4f   :  { %566 = vmatpush.bf16.msrb.mxu3 %v856_v49 }
  0x52   :  { %554 = vmatpush.bf16.msrb.mxu2 %v847_v2 }
  0x53   :  { %567 = vmatpush.bf16.msrb.mxu3 %v855_v51 }
  0x56   :  { %555 = vmatpush.bf16.msrb.mxu2 %v846_v4 }
  0x57   :  { %568 = vmatpush.bf16.msrb.mxu3 %v854_v1 }
  0x5a   :  { %556 = vmatpush.bf16.msrb.mxu2 %v845_v5 }
  0x5b   :  { %569 = vmatpush.bf16.msrb.mxu3 %v853_v3 }
  0xa1   :  { %v142_v54 = vpop.f32.mrf.mxu0  ;;  %v155_v55 = vpop.f32.mrf.mxu1 }
  0xa2   :  { %v143_v56 = vadd.f32 %v142_v54, %v110_v52  ;;  %v156_v57 = vadd.f32 %v155_v55, %v111_v53 }
  0xa4   :  { %v159_v58 = vmax.f32 %v143_v56, 0.0  ;;  %v160_v59 = vmax.f32 %v156_v57, 0.0 }
  0xa6   :  { %v161_v60 = vpack.c.bf16 %v159_v58, %v159_v58  ;;  %v162_v61 = vpack.c.bf16 %v160_v59, %v160_v59 }
  0xa8   :  { %369 = vmatmul.bf16.vlgmr.msra.gmra.mxu2 %v161_v60  ;;  %382 = vmatmul.bf16.vlgmr.msra.gmra.mxu3 %v162_v61 }
  0xa9   :  { %395 = vmatmul.bf16.vlgmr.msrb.gmra.mxu0 %v161_v60  ;;  %408 = vmatmul.bf16.vlgmr.msrb.gmra.mxu1 %v162_v61  ;;  %v144_v62 = vpop.f32.mrf.mxu0  ;;  %v157_v63 = vpop.f32.mrf.mxu1 }
 0x126   :  { %v396_v8 = vpop.f32.mrf.mxu0  ;;  %v409_v9 = vpop.f32.mrf.mxu1 }
 0x127   :  { %v397_v10 = vadd.f32 %v396_v8, %v198_v7 }
 0x129   :  { %v410_v12 = vadd.f32 %v409_v9, %v397_v10 }
 0x12b   :  { %v414_v13 = vmax.f32 %v410_v12, 0.0  ;;  %v370_v14 = vpop.f32.mrf.mxu2  ;;  %v383_v15 = vpop.f32.mrf.mxu3 }
 0x12c   :  { %v371_v16 = vadd.f32 %v370_v14, %v197_v11 }
 0x12d   :  { %v416_v17 = vpack.c.bf16 %v414_v13, %v414_v13 }
 0x12e   :  { %v384_v18 = vadd.f32 %v383_v15, %v371_v16  ;;  %v398_v19 = vpop.f32.mrf.mxu0  ;;  %v411_v20 = vpop.f32.mrf.mxu1 }
 0x12f   :  { %570 = vmatmul.bf16.vlgmr.msrb.gmra.mxu3 %v416_v17 }
 0x130   :  { %v413_v21 = vmax.f32 %v384_v18, 0.0 }
 0x132   :  { %v415_v22 = vpack.c.bf16 %v413_v21, %v413_v21 }
 0x133   :  { %v372_v23 = vpop.f32.mrf.mxu2  ;;  %v385_v24 = vpop.f32.mrf.mxu3 }
 0x134   :  { %557 = vmatmul.bf16.vlgmr.msrb.gmra.mxu2 %v415_v22 }
 0x1b2   :  { %v571_v26 = vpop.f32.mrf.mxu3 }
 0x1b7   :  { %v558_v29 = vpop.f32.mrf.mxu2 }
 0x1b8   :  { %v559_v30 = vadd.f32 %v874_v28, %v558_v29 }
 0x1ba   :  { %v572_v33 = vadd.f32 %v571_v26, %v559_v30  ;;  %v573_v34 = vpop.f32.mrf.mxu3 }
 0x1bc   :  { %v580_v35 = vmul.f32 %v579_v32, %v572_v33 }
 0x1be   :  { %875 = vtanh.f32 %v580_v35 }
 0x1bf   :  { %v560_v36 = vpop.f32.mrf.mxu2 }
 0x1c4   :  { %v876_v37 = vpop.eup %875 }
 0x1c5   :  { %v582_v38 = vadd.f32 1.0, %v876_v37  ;;  %v584_v39 = vmul.f32 2.0, %v876_v37 }
 0x1c7   :  { %v583_v40 = vmul.f32 0.11, %v582_v38  ;;  %v585_v41 = vsel %vm578_vm2, %v584_v39, %v572_v33 }
 0x1c9   :  { %v586_v42 = vsel %vm577_vm1, %v583_v40, %v585_v41 }
 0x1ca   :  { %587 = vst [vmem:[#allocation11] sm:$0xff] %v586_v42 }
 0x1cb   :  { %591 = vsyncadd [#allocation4], 64  ;;  %s594_s8 = sshll.u32 %s1123_s7, 4  ;;  %s1041_s9 = smov [#allocation11]   ;;  %s595_s8 = int_to_ptr.hbm [resolvable:$true] %s594_s8 }
 0x1cc   :  { %s592_s10 = sshll.u32 %s1041_s9, 4  ;;  %s593_s10 = int_to_ptr.vmem [resolvable:$true] %s592_s10 }
 0x1cd   :  { %600 = dma.vmem_to_hbm [thread:$0]  %s593_s10, 64, %s595_s8, [#allocation4], %s1038_s27, %s1038_s27, %s1039_s28  }
 0x1ce   :  { %1027 = dma.done.wait [#allocation4], 128  }
 0x1cf   :  { %1028 = vsyncadd [#allocation4], 4294967168 }
 0x1d0   :  { %605 = vsyncpa [#allocation3], 1 }
 0x1d1   :  { %606 = vsyncpa [#allocation6], 1 }
 0x1d2   :  { %607 = vsyncpa [#allocation9], 1 }
 0x1d3   :  { %608 = vsyncpa [#allocation4], 1 }

</bundles_post_ra>
